<compile_context>
chip_gen: v7x
topology: tpu7x:2x2x1
jax: 0.10.0
libtpu: 0.0.40
codegen_flags: <defaults>
</compile_context>

<pallas_src>
import functools

import jax
import jax.numpy as jnp
from jax import lax
from jax.experimental import pallas as pl
from jax.experimental.pallas import tpu as pltpu

SOBEL_X = ((-1.0, 0.0, 1.0),
           (-2.0, 0.0, 2.0),
           (-1.0, 0.0, 1.0))
SOBEL_Y = ((-1.0, -2.0, -1.0),
           ( 0.0,  0.0,  0.0),
           ( 1.0,  2.0,  1.0))


def _round_up(x, m):
    return (x + m - 1) // m * m


def _shift_lanes(x, k):
    """x[..., j] -> x[..., j + k] (cyclic) via an XLU lane rotate."""
    if k == 0:
        return x
    n = x.shape[-1]
    return pltpu.roll(x, n - k, axis=x.ndim - 1)


def _contrast_kernel(g_ref, m_ref, out_ref, *, H, W, SH):
    # g_ref / m_ref: (Nb, SH + 8, Wp) f32 slabs; the slab for strip `s` holds
    #   padded-plane rows [s*SH, s*SH + SH + 8) (1-pixel conv halo + strip halo
    #   + (8,128) alignment padding, all zero-filled by the wrapper).
    # out_ref: (Nb, 1, Wp) f32 lane-dense per-(image, strip) partial sums.
    s = pl.program_id(1)            # strip index
    Nb = g_ref.shape[0]
    Wp = g_ref.shape[2]

    # ---- Row (sublane) pass: three row-offset loads per plane (uses the vld
    # slots instead of XLU rolls); separable taps combine on the VPU.
    g0 = g_ref[:, pl.ds(0, SH), :]
    g1 = g_ref[:, pl.ds(1, SH), :]
    g2 = g_ref[:, pl.ds(2, SH), :]
    m0 = m_ref[:, pl.ds(0, SH), :]
    m1 = m_ref[:, pl.ds(1, SH), :]
    m2 = m_ref[:, pl.ds(2, SH), :]
    rx = (g0 + g2) + (g1 + g1)      # sobel_x row taps: [ 1, 2, 1]
    ry = g2 - g0                    # sobel_y row taps: [-1, 0, 1]
    rm = (m0 + m1) + m2             # box     row taps: [ 1, 1, 1]

    # ---- Column (lane) pass: 5 XLU lane rotates finish the separable taps.
    gx = _shift_lanes(rx, 2) - rx                             # cols [-1, 0, 1]
    ry1 = _shift_lanes(ry, 1)
    gy = (ry + _shift_lanes(ry, 2)) + (ry1 + ry1)             # cols [ 1, 2, 1]
    ms = (rm + _shift_lanes(rm, 1)) + _shift_lanes(rm, 2)     # cols [ 1, 1, 1]

    grad = jnp.sqrt(gx * gx + gy * gy + 1e-8)
    boundary = jnp.logical_and(ms > 0.0, ms < 9.0)

    # Valid conv outputs of this strip: global output row s*SH + t < H and
    # output column j < W (alignment padding / lane wrap-around excluded).
    row_t = lax.broadcasted_iota(jnp.int32, (Nb, SH, Wp), 1)
    col_j = lax.broadcasted_iota(jnp.int32, (Nb, SH, Wp), 2)
    valid = jnp.logical_and(row_t + s * SH < H, col_j < W)

    contrib = jnp.where(jnp.logical_and(boundary, valid), grad, 0.0)
    # Lane-dense per-(image, strip) partial row; the wrapper finishes the sum.
    out_ref[...] = jnp.sum(contrib, axis=1, keepdims=True)


def _choose_strip_rows(H, Wp):
    """Output rows per strip: <=512, multiple of 8, ~<=2 MiB per f32 plane."""
    budget_rows = max(8, (2 * 1024 * 1024 // (Wp * 4)) // 8 * 8)
    return max(8, min(_round_up(H, 8), budget_rows, 512))


def contrast_loss(image, mask):
    """image: (N, C>=3, H, W); mask: (N, 1, H, W). Returns scalar f32 mean."""
    image = image.astype(jnp.float32)
    mask = mask.astype(jnp.float32)
    N, _, H, W = image.shape

    # Grayscale fused into the wrapper; a single pad provides the conv halo
    # and zero-fills up to lane/sublane-aligned (8, 128) tiles.
    gray = 0.299 * image[:, 0] + 0.587 * image[:, 1] + 0.114 * image[:, 2]
    msk = mask[:, 0]

    Wp = _round_up(W + 2, 128)
    SH = _choose_strip_rows(H, Wp)          # output rows per strip
    num_strips = -(-H // SH)
    SH_IN = SH + 8                          # slab rows (strip + baked-in halo)
    Hp = num_strips * SH + 8

    pad = ((0, 0), (1, Hp - H - 1), (1, Wp - W - 1))
    gray_p = jnp.pad(gray, pad)
    msk_p = jnp.pad(msk, pad)

    # Strip slabs with the 2-row halo (rounded to 8 for sublane alignment)
    # baked in, so plain non-overlapping BlockSpecs + auto double-buffering
    # can be used; the duplicated halo costs only ~8/SH extra bytes.
    g_strips = jnp.stack(
        [gray_p[:, s * SH:s * SH + SH_IN] for s in range(num_strips)], axis=0)
    m_strips = jnp.stack(
        [msk_p[:, s * SH:s * SH + SH_IN] for s in range(num_strips)], axis=0)

    # Batch several small images per grid step (~0.35 us per-step overhead):
    # largest divisor of N whose per-step input stays under ~2 MiB.
    Nb = 1
    for d in range(N, 0, -1):
        if N % d == 0 and d * 2 * SH_IN * Wp * 4 <= 2 * 1024 * 1024:
            Nb = d
            break

    # VMEM limit from the actual block geometry (2 planes x 2 buffers + ~12
    # live full-tile temporaries + headroom), capped below v7x's 64 MiB.
    plane_block = Nb * SH_IN * Wp * 4
    vmem_limit = int(min(48 << 20,
                         max(16 << 20,
                             4 * plane_block + 12 * Nb * SH * Wp * 4 + (2 << 20))))

    kernel = functools.partial(_contrast_kernel, H=H, W=W, SH=SH)
    partials = pl.pallas_call(
        kernel,
        out_shape=jax.ShapeDtypeStruct((num_strips, N, 1, Wp), jnp.float32),
        grid_spec=pltpu.PrefetchScalarGridSpec(
            num_scalar_prefetch=0,
            grid=(N // Nb, num_strips),
            in_specs=[
                pl.BlockSpec((pl.Squeezed(), Nb, SH_IN, Wp),
                             lambda b, s: (s, b, 0, 0)),
                pl.BlockSpec((pl.Squeezed(), Nb, SH_IN, Wp),
                             lambda b, s: (s, b, 0, 0)),
            ],
            out_specs=pl.BlockSpec((pl.Squeezed(), Nb, 1, Wp),
                                   lambda b, s: (s, b, 0, 0)),
        ),
        compiler_params=pltpu.CompilerParams(
            dimension_semantics=("parallel", "parallel"),
            vmem_limit_bytes=vmem_limit),
    )(g_strips, m_strips)

    return jnp.sum(partials) / jnp.float32(N * H * W)


def _reference(image, mask):
    """Pure-JAX reference (same math as the PyTorch module) for validation."""
    image = image.astype(jnp.float32)
    mask = mask.astype(jnp.float32)
    N, _, H, W = image.shape
    gray = 0.299 * image[:, 0] + 0.587 * image[:, 1] + 0.114 * image[:, 2]
    gray_p = jnp.pad(gray, ((0, 0), (1, 1), (1, 1)))
    msk_p = jnp.pad(mask[:, 0], ((0, 0), (1, 1), (1, 1)))
    gx = jnp.zeros((N, H, W), jnp.float32)
    gy = jnp.zeros((N, H, W), jnp.float32)
    ms = jnp.zeros((N, H, W), jnp.float32)
    for di in range(3):
        for dj in range(3):
            pg = gray_p[:, di:di + H, dj:dj + W]
            pm = msk_p[:, di:di + H, dj:dj + W]
            gx = gx + SOBEL_X[di][dj] * pg
            gy = gy + SOBEL_Y[di][dj] * pg
            ms = ms + pm
    gm = jnp.sqrt(gx * gx + gy * gy + 1e-8)
    bm = jnp.logical_and(ms > 0.0, ms < 9.0).astype(jnp.float32)
    return jnp.mean(gm * bm)


if __name__ == "__main__":
    key = jax.random.PRNGKey(0)
    k_img, k_msk = jax.random.split(key)
    N, C, H, W = 2, 3, 16, 16
    image = jax.random.uniform(k_img, (N, C, H, W), dtype=jnp.float32)
    mask = (jax.random.uniform(k_msk, (N, 1, H, W)) > 0.5).astype(jnp.float32)

    loss = jax.jit(contrast_loss)(image, mask)
    jax.block_until_ready(loss)

    ref = _reference(image, mask)
    assert jnp.allclose(loss, ref, rtol=1e-4, atol=1e-6), (loss, ref)
    print("KERNEL_OK")
</pallas_src>

<mosaic_0001>
module attributes {stable_mosaic.version = 11 : i64} {
  func.func @_contrast_kernel(%arg0: i32, %arg1: i32, %arg2: memref<1x2x24x128xf32, #tpu.memory_space<vmem>>, %arg3: memref<1x2x24x128xf32, #tpu.memory_space<vmem>>, %arg4: memref<1x2x1x128xf32, #tpu.memory_space<vmem>>) attributes {dimension_semantics = [#tpu.dimension_semantics<parallel>, #tpu.dimension_semantics<parallel>], iteration_bounds = array<i64: 1, 1>, scalar_prefetch = 0 : i64, scratch_operands = 0 : i64, tpu.core_type = #tpu.core_type<tc>, window_params = [{transform_indices = @transform_0, window_bounds = array<i64: 1, 2, 24, 128>}, {transform_indices = @transform_1, window_bounds = array<i64: 1, 2, 24, 128>}, {transform_indices = @transform_2, window_bounds = array<i64: 1, 2, 1, 128>}]} {
    %c0 = arith.constant 0 : index
    %c0_0 = arith.constant 0 : index
    %c0_1 = arith.constant 0 : index
    %c0_2 = arith.constant 0 : index
    %0 = vector.load %arg2[%c0, %c0_0, %c0_1, %c0_2] : memref<1x2x24x128xf32, #tpu.memory_space<vmem>>, vector<1x2x16x128xf32>
    %1 = vector.shape_cast %0 : vector<1x2x16x128xf32> to vector<2x16x128xf32>
    %c0_3 = arith.constant 0 : index
    %c0_4 = arith.constant 0 : index
    %c1 = arith.constant 1 : index
    %c0_5 = arith.constant 0 : index
    %2 = vector.load %arg2[%c0_3, %c0_4, %c1, %c0_5] : memref<1x2x24x128xf32, #tpu.memory_space<vmem>>, vector<1x2x16x128xf32>
    %3 = vector.shape_cast %2 : vector<1x2x16x128xf32> to vector<2x16x128xf32>
    %c0_6 = arith.constant 0 : index
    %c0_7 = arith.constant 0 : index
    %c2 = arith.constant 2 : index
    %c0_8 = arith.constant 0 : index
    %4 = vector.load %arg2[%c0_6, %c0_7, %c2, %c0_8] : memref<1x2x24x128xf32, #tpu.memory_space<vmem>>, vector<1x2x16x128xf32>
    %5 = vector.shape_cast %4 : vector<1x2x16x128xf32> to vector<2x16x128xf32>
    %c0_9 = arith.constant 0 : index
    %c0_10 = arith.constant 0 : index
    %c0_11 = arith.constant 0 : index
    %c0_12 = arith.constant 0 : index
    %6 = vector.load %arg3[%c0_9, %c0_10, %c0_11, %c0_12] : memref<1x2x24x128xf32, #tpu.memory_space<vmem>>, vector<1x2x16x128xf32>
    %7 = vector.shape_cast %6 : vector<1x2x16x128xf32> to vector<2x16x128xf32>
    %c0_13 = arith.constant 0 : index
    %c0_14 = arith.constant 0 : index
    %c1_15 = arith.constant 1 : index
    %c0_16 = arith.constant 0 : index
    %8 = vector.load %arg3[%c0_13, %c0_14, %c1_15, %c0_16] : memref<1x2x24x128xf32, #tpu.memory_space<vmem>>, vector<1x2x16x128xf32>
    %9 = vector.shape_cast %8 : vector<1x2x16x128xf32> to vector<2x16x128xf32>
    %c0_17 = arith.constant 0 : index
    %c0_18 = arith.constant 0 : index
    %c2_19 = arith.constant 2 : index
    %c0_20 = arith.constant 0 : index
    %10 = vector.load %arg3[%c0_17, %c0_18, %c2_19, %c0_20] : memref<1x2x24x128xf32, #tpu.memory_space<vmem>>, vector<1x2x16x128xf32>
    %11 = vector.shape_cast %10 : vector<1x2x16x128xf32> to vector<2x16x128xf32>
    %12 = arith.addf %1, %5 : vector<2x16x128xf32>
    %13 = arith.addf %3, %3 : vector<2x16x128xf32>
    %14 = arith.addf %12, %13 : vector<2x16x128xf32>
    %15 = arith.subf %5, %1 : vector<2x16x128xf32>
    %16 = arith.addf %7, %9 : vector<2x16x128xf32>
    %17 = arith.addf %16, %11 : vector<2x16x128xf32>
    %c126_i32 = arith.constant 126 : i32
    %18 = tpu.dynamic_rotate %14 by %c126_i32 dim 2 : vector<2x16x128xf32>, i32 -> vector<2x16x128xf32>
    %19 = arith.subf %18, %14 : vector<2x16x128xf32>
    %c127_i32 = arith.constant 127 : i32
    %20 = tpu.dynamic_rotate %15 by %c127_i32 dim 2 : vector<2x16x128xf32>, i32 -> vector<2x16x128xf32>
    %c126_i32_21 = arith.constant 126 : i32
    %21 = tpu.dynamic_rotate %15 by %c126_i32_21 dim 2 : vector<2x16x128xf32>, i32 -> vector<2x16x128xf32>
    %22 = arith.addf %15, %21 : vector<2x16x128xf32>
    %23 = arith.addf %20, %20 : vector<2x16x128xf32>
    %24 = arith.addf %22, %23 : vector<2x16x128xf32>
    %c127_i32_22 = arith.constant 127 : i32
    %25 = tpu.dynamic_rotate %17 by %c127_i32_22 dim 2 : vector<2x16x128xf32>, i32 -> vector<2x16x128xf32>
    %26 = arith.addf %17, %25 : vector<2x16x128xf32>
    %c126_i32_23 = arith.constant 126 : i32
    %27 = tpu.dynamic_rotate %17 by %c126_i32_23 dim 2 : vector<2x16x128xf32>, i32 -> vector<2x16x128xf32>
    %28 = arith.addf %26, %27 : vector<2x16x128xf32>
    %29 = arith.mulf %19, %19 : vector<2x16x128xf32>
    %30 = arith.mulf %24, %24 : vector<2x16x128xf32>
    %31 = arith.addf %29, %30 : vector<2x16x128xf32>
    %cst = arith.constant 9.99999993E-9 : f32
    %32 = vector.broadcast %cst : f32 to vector<2x16x128xf32>
    %33 = arith.addf %31, %32 : vector<2x16x128xf32>
    %34 = math.sqrt %33 : vector<2x16x128xf32>
    %cst_24 = arith.constant 0.000000e+00 : f32
    %35 = vector.broadcast %cst_24 : f32 to vector<2x16x128xf32>
    %36 = arith.cmpf ogt, %28, %35 : vector<2x16x128xf32>
    %cst_25 = arith.constant 9.000000e+00 : f32
    %37 = vector.broadcast %cst_25 : f32 to vector<2x16x128xf32>
    %38 = arith.cmpf olt, %28, %37 : vector<2x16x128xf32>
    %39 = arith.andi %36, %38 : vector<2x16x128xi1>
    %40 = tpu.iota {dimensions = array<i32: 1>} : vector<2x16x128xi32>
    %41 = tpu.iota {dimensions = array<i32: 2>} : vector<2x16x128xi32>
    %c16_i32 = arith.constant 16 : i32
    %42 = arith.muli %arg1, %c16_i32 : i32
    %43 = vector.broadcast %42 : i32 to vector<2x16x128xi32>
    %44 = arith.addi %40, %43 : vector<2x16x128xi32>
    %c16_i32_26 = arith.constant 16 : i32
    %45 = vector.broadcast %c16_i32_26 : i32 to vector<2x16x128xi32>
    %46 = arith.cmpi slt, %44, %45 : vector<2x16x128xi32>
    %c16_i32_27 = arith.constant 16 : i32
    %47 = vector.broadcast %c16_i32_27 : i32 to vector<2x16x128xi32>
    %48 = arith.cmpi slt, %41, %47 : vector<2x16x128xi32>
    %49 = arith.andi %46, %48 : vector<2x16x128xi1>
    %50 = arith.andi %39, %49 : vector<2x16x128xi1>
    %cst_28 = arith.constant 0.000000e+00 : f32
    %51 = vector.broadcast %cst_28 : f32 to vector<2x16x128xf32>
    %52 = arith.select %50, %34, %51 : vector<2x16x128xi1>, vector<2x16x128xf32>
    %cst_29 = arith.constant dense<0.000000e+00> : vector<2x128xf32>
    %53 = vector.multi_reduction <add>, %52, %cst_29 [1] : vector<2x16x128xf32> to vector<2x128xf32>
    %54 = vector.shape_cast %53 : vector<2x128xf32> to vector<2x1x128xf32>
    %c0_30 = arith.constant 0 : index
    %c0_31 = arith.constant 0 : index
    %c0_32 = arith.constant 0 : index
    %c0_33 = arith.constant 0 : index
    %55 = vector.load %arg4[%c0_30, %c0_31, %c0_32, %c0_33] : memref<1x2x1x128xf32, #tpu.memory_space<vmem>>, vector<1x2x1x128xf32>
    %56 = vector.shape_cast %55 : vector<1x2x1x128xf32> to vector<2x1x128xf32>
    %57 = vector.shape_cast %54 : vector<2x1x128xf32> to vector<1x2x1x128xf32>
    tpu.vector_store %arg4[%c0_30, %c0_31, %c0_32, %c0_33], %57 {strides = array<i32>} : memref<1x2x1x128xf32, #tpu.memory_space<vmem>>, vector<1x2x1x128xf32>,
    return
  }
  func.func @transform_0(%arg0: i32, %arg1: i32) -> (i32, i32, i32, i32) {
    %c0_i32 = arith.constant 0 : i32
    %c0_i32_0 = arith.constant 0 : i32
    %c0_i32_1 = arith.constant 0 : i32
    return %arg1, %arg0, %c0_i32, %c0_i32_0 : i32, i32, i32, i32
  }
  func.func @transform_1(%arg0: i32, %arg1: i32) -> (i32, i32, i32, i32) {
    %c0_i32 = arith.constant 0 : i32
    %c0_i32_0 = arith.constant 0 : i32
    %c0_i32_1 = arith.constant 0 : i32
    return %arg1, %arg0, %c0_i32, %c0_i32_0 : i32, i32, i32, i32
  }
  func.func @transform_2(%arg0: i32, %arg1: i32) -> (i32, i32, i32, i32) {
    %c0_i32 = arith.constant 0 : i32
    %c0_i32_0 = arith.constant 0 : i32
    %c0_i32_1 = arith.constant 0 : i32
    return %arg1, %arg0, %c0_i32, %c0_i32_0 : i32, i32, i32, i32
  }
}

</mosaic_0001>

<bundles_post_ra>
// kernel: contrast_loss.1
= control target key start
LH: loop header
LB: loop body
LE: loop exit
PB: predicated region body
PF: predicated region fallthrough
CT: control target
= control target key end

     0   :  { %s231_s25 = smov 127   ;;  %s232_s30 = smov 126   ;;  %s427_s0 = inlined_call_operand.vmem [shape: f32[1,2,24,128], index: 0, kind: input, shape index: {}]   ;;  %s428_s1 = inlined_call_operand.vmem [shape: f32[1,2,24,128], index: 1, kind: input, shape index: {}]   ;;  %s429_s2 = inlined_call_operand.vmem [shape: f32[1,2,1,128], index: 2, kind: output, shape index: {}]  }
   0x1   :  { %v13_v0 = vld [vmem:[%s427_s0 + $0x18] sm:$0xff]  ;;  %v11_v2 = vld [vmem:[%s427_s0] sm:$0xff]  ;;  %v12_v8 = vld [vmem:[%s427_s0 + $0x8] sm:$0xff] }
   0x2   :  { %v21_v1 = vld [vmem:[%s427_s0 + $0x1a] sm:$0xff]  ;;  %v19_v4 = vld [vmem:[%s427_s0 + $0x2] sm:$0xff]  ;;  %v20_v9 = vld [vmem:[%s427_s0 + $0xa] sm:$0xff] }
   0x3   :  { %v257_v3 = vsub.f32 %v21_v1, %v13_v0  ;;  %v14_v5 = vld [vmem:[%s427_s0 + $0x20] sm:$0xff]  ;;  %v268_v7 = vsub.f32 %v19_v4, %v11_v2  ;;  %v282_v11 = vsub.f32 %v20_v9, %v12_v8  ;;  %v16_v12 = vld [vmem:[%s427_s0 + $0x9] sm:$0xff]  ;;  %v36_v14 = vadd.f32 %v20_v9, %v12_v8  ;;  %v25_v38 = vld [vmem:[%s428_s1 + $0x18] sm:$0xff] }
   0x4   :  { %v22_v6 = vld [vmem:[%s427_s0 + $0x22] sm:$0xff]  ;;  %v40_v15 = vadd.f32 %v16_v12, %v16_v12  ;;  %v35_v16 = vadd.f32 %v19_v4, %v11_v2  ;;  %v17_v19 = vld [vmem:[%s427_s0 + $0x19] sm:$0xff]  ;;  %v37_v24 = vadd.f32 %v21_v1, %v13_v0  ;;  %v32_v33 = vld [vmem:[%s428_s1 + $0xa] sm:$0xff] }
   0x5   :  { %75 = vrot.lane.b32.xlu1 %v257_v3, %s231_s25  ;;  %v278_v10 = vsub.f32 %v22_v6, %v14_v5  ;;  %71 = vrot.lane.b32.xlu0 %v268_v7, %s231_s25  ;;  %v15_v13 = vld [vmem:[%s427_s0 + $0x1] sm:$0xff]  ;;  %v38_v21 = vadd.f32 %v22_v6, %v14_v5  ;;  %v41_v25 = vadd.f32 %v17_v19, %v17_v19  ;;  %v28_v27 = vld [vmem:[%s428_s1 + $0x9] sm:$0xff] }
   0x6   :  { %v39_v17 = vadd.f32 %v15_v13, %v15_v13  ;;  %v18_v18 = vld [vmem:[%s427_s0 + $0x21] sm:$0xff]  ;;  %v44_v20 = vadd.f32 %v40_v15, %v36_v14  ;;  %v29_v39 = vld [vmem:[%s428_s1 + $0x19] sm:$0xff] }
   0x7   :  { %v42_v22 = vadd.f32 %v18_v18, %v18_v18  ;;  %v24_v26 = vld [vmem:[%s428_s1 + $0x8] sm:$0xff]  ;;  %v23_v28 = vld [vmem:[%s428_s1] sm:$0xff]  ;;  %v45_v32 = vadd.f32 %v41_v25, %v37_v24  ;;  %v53_v44 = vadd.f32 %v29_v39, %v25_v38 }
   0x8   :  { %v43_v23 = vadd.f32 %v39_v17, %v35_v16  ;;  %v27_v29 = vld [vmem:[%s428_s1 + $0x1] sm:$0xff]  ;;  %v52_v31 = vadd.f32 %v28_v27, %v24_v26  ;;  %v182_v27 = vlaneseq }
   0x9   :  { %77 = vrot.lane.b32.xlu1 %v278_v10, %s231_s25  ;;  %73 = vrot.lane.b32.xlu0 %v282_v11, %s231_s25  ;;  %v46_v30 = vadd.f32 %v42_v22, %v38_v21  ;;  %v51_v34 = vadd.f32 %v27_v29, %v23_v28  ;;  %v26_v35 = vld [vmem:[%s428_s1 + $0x20] sm:$0xff] }
   0xa   :  { %v30_v36 = vld [vmem:[%s428_s1 + $0x21] sm:$0xff]  ;;  %v341_v40 = vadd.f32 %v52_v31, %v32_v33  ;;  %v381_v33 = vand.u32 127, %v182_v27 }
   0xb   :  { %v31_v37 = vld [vmem:[%s428_s1 + $0x2] sm:$0xff]  ;;  %v54_v41 = vadd.f32 %v30_v36, %v26_v35  ;;  %v33_v45 = vld [vmem:[%s428_s1 + $0x1a] sm:$0xff] }
   0xc   :  { %v344_v42 = vadd.f32 %v51_v34, %v31_v37  ;;  %v34_v43 = vld [vmem:[%s428_s1 + $0x22] sm:$0xff]  ;;  %v358_v47 = vadd.f32 %v53_v44, %v33_v45  ;;  %vm190_vm0 = vcmp.lt.s32.totalorder %v381_v33, 16 }
   0xd   :  { %81 = vrot.lane.b32.xlu1 %v282_v11, %s232_s30  ;;  %79 = vrot.lane.b32.xlu0 %v268_v7, %s232_s30  ;;  %v354_v46 = vadd.f32 %v54_v41, %v34_v43 }
  0x11   :  { %85 = vrot.lane.b32.xlu1 %v278_v10, %s232_s30  ;;  %83 = vrot.lane.b32.xlu0 %v257_v3, %s232_s30 }
  0x15   :  { %61 = vrot.lane.b32.xlu1 %v44_v20, %s232_s30  ;;  %59 = vrot.lane.b32.xlu0 %v43_v23, %s232_s30 }
  0x19   :  { %65 = vrot.lane.b32.xlu1 %v46_v30, %s232_s30  ;;  %63 = vrot.lane.b32.xlu0 %v45_v32, %s232_s30 }
  0x1d   :  { %101 = vrot.lane.b32.xlu1 %v341_v40, %s231_s25  ;;  %99 = vrot.lane.b32.xlu0 %v344_v42, %s231_s25 }
  0x21   :  { %105 = vrot.lane.b32.xlu1 %v354_v46, %s231_s25  ;;  %103 = vrot.lane.b32.xlu0 %v358_v47, %s231_s25 }
  0x25   :  { %113 = vrot.lane.b32.xlu1 %v341_v40, %s232_s30  ;;  %111 = vrot.lane.b32.xlu0 %v344_v42, %s232_s30 }
  0x29   :  { %117 = vrot.lane.b32.xlu1 %v354_v46, %s232_s30  ;;  %115 = vrot.lane.b32.xlu0 %v358_v47, %s232_s30 }
  0x77   :  { %v76_v48 = vpop.permute.xlu1 %75  ;;  %v72_v49 = vpop.permute.xlu0 %71 }
  0x78   :  { %v91_v59 = vadd.f32 %v72_v49, %v72_v49  ;;  %v93_v5 = vadd.f32 %v76_v48, %v76_v48 }
  0x7b   :  { %v78_v50 = vpop.permute.xlu1 %77  ;;  %v74_v51 = vpop.permute.xlu0 %73 }
  0x7c   :  { %v92_v57 = vadd.f32 %v74_v51, %v74_v51  ;;  %v94_v1 = vadd.f32 %v78_v50, %v78_v50 }
  0x7f   :  { %v82_v52 = vpop.permute.xlu1 %81  ;;  %v80_v53 = vpop.permute.xlu0 %79 }
  0x80   :  { %v88_v54 = vadd.f32 %v82_v52, %v282_v11  ;;  %v87_v55 = vadd.f32 %v80_v53, %v268_v7 }
  0x82   :  { %v96_v60 = vadd.f32 %v92_v57, %v88_v54  ;;  %v95_v62 = vadd.f32 %v91_v59, %v87_v55 }
  0x83   :  { %v86_v56 = vpop.permute.xlu1 %85  ;;  %v84_v58 = vpop.permute.xlu0 %83 }
  0x84   :  { %v90_v61 = vadd.f32 %v86_v56, %v278_v10  ;;  %v89_v63 = vadd.f32 %v84_v58, %v257_v3  ;;  %v128_v8 = vmul.f32 %v96_v60, %v96_v60  ;;  %v127_v7 = vmul.f32 %v95_v62, %v95_v62 }
  0x86   :  { %v98_v9 = vadd.f32 %v94_v1, %v90_v61  ;;  %v97_v12 = vadd.f32 %v93_v5, %v89_v63 }
  0x87   :  { %v62_v0 = vpop.permute.xlu1 %61  ;;  %v60_v4 = vpop.permute.xlu0 %59 }
  0x88   :  { %v68_v2 = vsub.f32 %v62_v0, %v44_v20  ;;  %v67_v6 = vsub.f32 %v60_v4, %v43_v23  ;;  %v130_v19 = vmul.f32 %v98_v9, %v98_v9  ;;  %v129_v22 = vmul.f32 %v97_v12, %v97_v12 }
  0x8a   :  { %v124_v11 = vmul.f32 %v68_v2, %v68_v2  ;;  %v123_v13 = vmul.f32 %v67_v6, %v67_v6 }
  0x8b   :  { %v66_v14 = vpop.permute.xlu1 %65  ;;  %v64_v17 = vpop.permute.xlu0 %63 }
  0x8c   :  { %v132_v15 = vadd.f32 %v128_v8, %v124_v11  ;;  %v70_v16 = vsub.f32 %v66_v14, %v46_v30  ;;  %v131_v10 = vadd.f32 %v127_v7, %v123_v13  ;;  %v69_v18 = vsub.f32 %v64_v17, %v45_v32 }
  0x8e   :  { %v136_v3 = vadd.f32 1e-08, %v132_v15  ;;  %v126_v21 = vmul.f32 %v70_v16, %v70_v16  ;;  %v135_v20 = vadd.f32 1e-08, %v131_v10  ;;  %v125_v24 = vmul.f32 %v69_v18, %v69_v18 }
  0x8f   :  { %v102_v25 = vpop.permute.xlu1 %101  ;;  %v100_v26 = vpop.permute.xlu0 %99 }
  0x90   :  { %223 = vrsqrt.f32 %v136_v3  ;;  %v134_v23 = vadd.f32 %v130_v19, %v126_v21  ;;  %v133_v28 = vadd.f32 %v129_v22, %v125_v24  ;;  %v108_v34 = vadd.f32 %v102_v25, %v341_v40 }
  0x91   :  { %225 = vrsqrt.f32 %v135_v20  ;;  %v107_v35 = vadd.f32 %v100_v26, %v344_v42  ;;  %vm148_vm1 = vcmp.eq.f32.partialorder %v136_v3, inf  ;;  %vm150_vm2 = vcmp.eq.f32.partialorder %v136_v3, 0.0 }
  0x92   :  { %v376_v29 = vadd.f32 1e-08, %v134_v23  ;;  %v378_v31 = vadd.f32 1e-08, %v133_v28  ;;  %v151_v39 = vand.u32 2147483648, %v136_v3  ;;  %vm141_vm5 = vcmp.eq.f32.partialorder %v135_v20, inf }
  0x93   :  { %v106_v30 = vpop.permute.xlu1 %105  ;;  %v104_v32 = vpop.permute.xlu0 %103  ;;  %vm143_vm10 = vcmp.eq.f32.partialorder %v135_v20, 0.0 }
  0x94   :  { %227 = vrsqrt.f32 %v376_v29  ;;  %v110_v44 = vadd.f32 %v106_v30, %v354_v46  ;;  %v109_v40 = vadd.f32 %v104_v32, %v358_v47  ;;  %v144_v46 = vand.u32 2147483648, %v135_v20 }
  0x95   :  { %229 = vrsqrt.f32 %v378_v31  ;;  %vm162_vm12 = vcmp.eq.f32.partialorder %v376_v29, inf  ;;  %vm164_vm13 = vcmp.eq.f32.partialorder %v376_v29, 0.0  ;;  %v165_v62 = vand.u32 2147483648, %v376_v29 }
  0x96   :  { %v158_v2 = vand.u32 2147483648, %v378_v31 }
  0x97   :  { %v114_v36 = vpop.permute.xlu1 %113  ;;  %v112_v38 = vpop.permute.xlu0 %111 }
  0x98   :  { %v120_v37 = vadd.f32 %v114_v36, %v108_v34  ;;  %v119_v41 = vadd.f32 %v112_v38, %v107_v35 }
  0x9a   :  { %v224_v43 = vpop.eup %223  ;;  %vm168_vm3 = vcmp.gt.f32.partialorder %v120_v37, 0.0  ;;  %vm172_vm4 = vcmp.lt.f32.partialorder %v120_v37, 9.0  ;;  %vm167_vm7 = vcmp.gt.f32.partialorder %v119_v41, 0.0  ;;  %vm171_vm8 = vcmp.lt.f32.partialorder %v119_v41, 9.0 }
  0x9b   :  { %v226_v45 = vpop.eup %225  ;;  %v147_v48 = vmul.f32 %v224_v43, %v136_v3  ;;  %vm176_vm6 = vmand %vm168_vm3, %vm172_vm4  ;;  %v118_v42 = vpop.permute.xlu1 %117 }
  0x9c   :  { %vm391_vm9 = vmand %vm176_vm6, %vm190_vm0  ;;  %v140_v50 = vmul.f32 %v226_v45, %v135_v20  ;;  %v122_v51 = vadd.f32 %v118_v42, %v110_v44  ;;  %v116_v52 = vpop.permute.xlu0 %115 }
  0x9d   :  { %v149_v53 = vsel %vm148_vm1, %v136_v3, %v147_v48  ;;  %vm175_vm11 = vmand %vm167_vm7, %vm171_vm8  ;;  %v121_v47 = vadd.f32 %v116_v52, %v109_v40  ;;  %vm157_vm8 = vcmp.eq.f32.partialorder %v378_v31, 0.0 }
  0x9e   :  { %v228_v54 = vpop.eup %227  ;;  %v152_v55 = vsel %vm150_vm2, %v151_v39, %v149_v53  ;;  %v142_v56 = vsel %vm141_vm5, %v135_v20, %v140_v50  ;;  %vm193_vm14 = vmand %vm175_vm11, %vm190_vm0  ;;  %vm170_vm15 = vcmp.gt.f32.partialorder %v122_v51, 0.0  ;;  %vm174_vm3 = vcmp.lt.f32.partialorder %v122_v51, 9.0 }
  0x9f   :  { %v230_v57 = vpop.eup %229  ;;  %v198_v58 = vsel %vm391_vm9, %v152_v55, 0.0  ;;  %v145_v59 = vsel %vm143_vm10, %v144_v46, %v142_v56  ;;  %v161_v60 = vmul.f32 %v228_v54, %v376_v29  ;;  %vm178_vm1 = vmand %vm170_vm15, %vm174_vm3  ;;  %vm169_vm4 = vcmp.gt.f32.partialorder %v121_v47, 0.0 }
  0xa0   :  { %v197_v61 = vsel %vm193_vm14, %v145_v59, 0.0  ;;  %v154_v63 = vmul.f32 %v230_v57, %v378_v31  ;;  %vm173_vm2 = vcmp.lt.f32.partialorder %v121_v47, 9.0  ;;  %vm155_vm5 = vcmp.eq.f32.partialorder %v378_v31, inf  ;;  %vm196_vm7 = vmand %vm178_vm1, %vm190_vm0 }
  0xa1   :  { %v201_v0 = vadd.f32 %v198_v58, %v197_v61  ;;  %v163_v1 = vsel %vm162_vm12, %v376_v29, %v161_v60  ;;  %vm177_vm6 = vmand %vm169_vm4, %vm173_vm2 }
  0xa2   :  { %v166_v4 = vsel %vm164_vm13, %v165_v62, %v163_v1  ;;  %v156_v5 = vsel %vm155_vm5, %v378_v31, %v154_v63  ;;  %vm195_vm9 = vmand %vm177_vm6, %vm190_vm0 }
  0xa3   :  { %v202_v6 = vrot.slane %v201_v0, 4  ;;  %v200_v8 = vsel %vm196_vm7, %v166_v4, 0.0  ;;  %v159_v9 = vsel %vm157_vm8, %v158_v2, %v156_v5 }
  0xa4   :  { %v199_v11 = vsel %vm195_vm9, %v159_v9, 0.0 }
  0xa5   :  { %v203_v7 = vadd.f32 %v202_v6, %v201_v0  ;;  %v208_v12 = vadd.f32 %v200_v8, %v199_v11 }
  0xa7   :  { %v204_v13 = vrot.slane %v203_v7, 2  ;;  %v209_v14 = vrot.slane %v208_v12, 4 }
  0xa9   :  { %v205_v15 = vadd.f32 %v204_v13, %v203_v7  ;;  %v210_v16 = vadd.f32 %v209_v14, %v208_v12 }
  0xab   :  { %v206_v17 = vrot.slane %v205_v15, 1  ;;  %v211_v10 = vrot.slane %v210_v16, 2 }
  0xad   :  { %v207_v18 = vadd.f32 %v206_v17, %v205_v15  ;;  %v212_v19 = vadd.f32 %v211_v10, %v210_v16 }
  0xaf   :  { %215 = vst [vmem:[%s429_s2] sm:$0x1] %v207_v18  ;;  %v213_v3 = vrot.slane %v212_v19, 1 }
  0xb1   :  { %v214_v21 = vadd.f32 %v213_v3, %v212_v19 }
  0xb3   :  { %216 = vst [vmem:[%s429_s2 + $0x1] sm:$0x1] %v214_v21 }

</bundles_post_ra>
